<compile_context>
chip_gen: v7x
topology: tpu7x:2x2x1
jax: 0.10.0
libtpu: 0.0.40
codegen_flags: <defaults>
</compile_context>

<pallas_src>
import functools
import math

import jax
import jax.numpy as jnp
from jax import lax
from jax.experimental import pallas as pl
from jax.experimental.pallas import tpu as pltpu


def _layernorm_kernel(x_ref, scale_ref, shift_ref, o_ref, *, eps):
    """x_ref/o_ref: (TM, E); scale_ref/shift_ref: (1, E)."""
    x = x_ref[...].astype(jnp.float32)                       # (TM, E)
    # One-pass stats in f32: var = E[x^2] - mean^2 (population variance).
    mean = jnp.mean(x, axis=-1, keepdims=True)               # (TM, 1)
    mean_sq = jnp.mean(x * x, axis=-1, keepdims=True)        # (TM, 1)
    var = jnp.maximum(mean_sq - mean * mean, 0.0)            # guard cancellation
    inv = lax.rsqrt(var + eps)                               # EUP rsqrt (free slot)
    scale = scale_ref[...].astype(jnp.float32)               # (1, E)
    shift = shift_ref[...].astype(jnp.float32)               # (1, E)
    o_ref[...] = ((x - mean) * inv * scale + shift).astype(o_ref.dtype)


def _sublane_multiple(dtype):
    """Row-tile alignment: sub-32-bit dtypes pack 2/4 rows per sublane."""
    itemsize = jnp.dtype(dtype).itemsize
    if itemsize >= 4:
        return 8
    if itemsize == 2:
        return 16
    return 32


def layer_norm(x, scale, shift, *, eps=1e-5,
               vmem_pipeline_budget=32 * 1024 * 1024):
    """LayerNorm over the last dim of `x` with learnable scale/shift.

    x:     (..., E)
    scale: (E,)
    shift: (E,)
    """
    orig_shape = x.shape
    E = orig_shape[-1]
    M = math.prod(orig_shape[:-1]) if len(orig_shape) > 1 else 1
    x2 = x.reshape(M, E)
    scale2 = scale.reshape(1, E)
    shift2 = shift.reshape(1, E)

    # TODO(synk): if emb_dim is not a multiple of 128, pad the feature dim to
    # lane width in the wrapper and mask the pad lanes out of the reductions
    # so the output store stays an unmasked lane-dense vst.

    in_bytes = jnp.dtype(x.dtype).itemsize
    out_bytes = in_bytes
    sub = _sublane_multiple(x.dtype)

    # Row tile from a total pipelined-VMEM budget:
    #   2x in tiles + 2x out tiles (double-buffered) + ~3 f32-tile temporaries.
    per_row_bytes = E * (2 * in_bytes + 2 * out_bytes + 3 * 4)
    tm = (vmem_pipeline_budget // per_row_bytes) // sub * sub
    tm = max(sub, tm)
    # Never larger than the (sublane-rounded-up) row count.
    m_rounded = ((M + sub - 1) // sub) * sub
    tm = min(tm, m_rounded)
    # v7x has 2 TensorCores: keep >= 2 grid steps whenever there is enough work.
    while tm > sub and pl.cdiv(M, tm) < 2:
        tm = max(sub, ((tm // 2) // sub) * sub)

    grid = (pl.cdiv(M, tm),)   # ragged tail handled by masked edge blocks

    # Scoped-VMEM limit: enough for the pipeline at this tile size, never below
    # the smallest per-gen default (16 MiB) and capped at 48 MiB (v7x-safe).
    tile_bytes = tm * per_row_bytes
    vmem_limit = int(min(48 * 1024 * 1024, max(16 * 1024 * 1024, 2 * tile_bytes)))

    out = pl.pallas_call(
        functools.partial(_layernorm_kernel, eps=eps),
        out_shape=jax.ShapeDtypeStruct((M, E), x.dtype),
        grid_spec=pltpu.PrefetchScalarGridSpec(
            num_scalar_prefetch=0,
            grid=grid,
            in_specs=[
                pl.BlockSpec((tm, E), lambda i: (i, 0)),   # activation rows
                pl.BlockSpec((1, E), lambda i: (0, 0)),    # scale (resident)
                pl.BlockSpec((1, E), lambda i: (0, 0)),    # shift (resident)
            ],
            out_specs=pl.BlockSpec((tm, E), lambda i: (i, 0)),
        ),
        compiler_params=pltpu.CompilerParams(
            dimension_semantics=("parallel",),             # megacore-shardable
            vmem_limit_bytes=vmem_limit,
        ),
    )(x2, scale2, shift2)

    return out.reshape(orig_shape)


if __name__ == "__main__":
    # Small shapes consistent with the module: batch=2, seq=8, emb_dim=128.
    B, T, E = 2, 8, 128
    key = jax.random.PRNGKey(0)
    k_x, k_s, k_b = jax.random.split(key, 3)

    x = jax.random.normal(k_x, (B, T, E), dtype=jnp.float32)
    # nn.Parameter init: scale=ones, shift=zeros; perturb slightly so the
    # affine path is actually exercised.
    scale = jnp.ones((E,), jnp.float32) + 0.1 * jax.random.normal(k_s, (E,), jnp.float32)
    shift = jnp.zeros((E,), jnp.float32) + 0.1 * jax.random.normal(k_b, (E,), jnp.float32)

    out = layer_norm(x, scale, shift)
    out = jax.block_until_ready(out)

    # Pure-JAX reference (unbiased=False population variance).
    mean = jnp.mean(x, axis=-1, keepdims=True)
    var = jnp.mean((x - mean) ** 2, axis=-1, keepdims=True)
    ref = scale * ((x - mean) / jnp.sqrt(var + 1e-5)) + shift

    assert out.shape == x.shape
    assert jnp.allclose(out, ref, atol=1e-5, rtol=1e-5), float(jnp.max(jnp.abs(out - ref)))

    print("KERNEL_OK")
</pallas_src>

<mosaic_0001>
module attributes {stable_mosaic.version = 11 : i64} {
  func.func @_layernorm_kernel(%arg0: i32, %arg1: memref<8x128xf32, #tpu.memory_space<vmem>>, %arg2: memref<1x128xf32, #tpu.memory_space<vmem>>, %arg3: memref<1x128xf32, #tpu.memory_space<vmem>>, %arg4: memref<8x128xf32, #tpu.memory_space<vmem>>) attributes {dimension_semantics = [#tpu.dimension_semantics<parallel>], iteration_bounds = array<i64: 2>, scalar_prefetch = 0 : i64, scratch_operands = 0 : i64, tpu.core_type = #tpu.core_type<tc>, window_params = [{transform_indices = @transform_0, window_bounds = array<i64: 8, 128>}, {pipeline_mode = #tpu.pipeline_mode<synchronous>, transform_indices = @transform_1, window_bounds = array<i64: 1, 128>}, {pipeline_mode = #tpu.pipeline_mode<synchronous>, transform_indices = @transform_2, window_bounds = array<i64: 1, 128>}, {transform_indices = @transform_3, window_bounds = array<i64: 8, 128>}]} {
    %c0 = arith.constant 0 : index
    %c0_0 = arith.constant 0 : index
    %0 = vector.load %arg1[%c0, %c0_0] : memref<8x128xf32, #tpu.memory_space<vmem>>, vector<8x128xf32>
    %cst = arith.constant dense<0.000000e+00> : vector<8xf32>
    %1 = vector.multi_reduction <add>, %0, %cst [1] : vector<8x128xf32> to vector<8xf32>
    %2 = vector.shape_cast %1 : vector<8xf32> to vector<8x1xf32>
    %cst_1 = arith.constant 1.280000e+02 : f32
    %3 = vector.broadcast %cst_1 : f32 to vector<8x1xf32>
    %4 = arith.divf %2, %3 : vector<8x1xf32>
    %5 = arith.mulf %0, %0 : vector<8x128xf32>
    %cst_2 = arith.constant dense<0.000000e+00> : vector<8xf32>
    %6 = vector.multi_reduction <add>, %5, %cst_2 [1] : vector<8x128xf32> to vector<8xf32>
    %7 = vector.shape_cast %6 : vector<8xf32> to vector<8x1xf32>
    %cst_3 = arith.constant 1.280000e+02 : f32
    %8 = vector.broadcast %cst_3 : f32 to vector<8x1xf32>
    %9 = arith.divf %7, %8 : vector<8x1xf32>
    %10 = arith.mulf %4, %4 : vector<8x1xf32>
    %11 = arith.subf %9, %10 : vector<8x1xf32>
    %cst_4 = arith.constant 0.000000e+00 : f32
    %12 = vector.broadcast %cst_4 : f32 to vector<8x1xf32>
    %13 = arith.maximumf %11, %12 : vector<8x1xf32>
    %cst_5 = arith.constant 9.99999974E-6 : f32
    %14 = vector.broadcast %cst_5 : f32 to vector<8x1xf32>
    %15 = arith.addf %13, %14 : vector<8x1xf32>
    %16 = math.rsqrt %15 : vector<8x1xf32>
    %c0_6 = arith.constant 0 : index
    %c0_7 = arith.constant 0 : index
    %17 = vector.load %arg2[%c0_6, %c0_7] : memref<1x128xf32, #tpu.memory_space<vmem>>, vector<1x128xf32>
    %c0_8 = arith.constant 0 : index
    %c0_9 = arith.constant 0 : index
    %18 = vector.load %arg3[%c0_8, %c0_9] : memref<1x128xf32, #tpu.memory_space<vmem>>, vector<1x128xf32>
    %19 = vector.broadcast %4 : vector<8x1xf32> to vector<8x128xf32>
    %20 = arith.subf %0, %19 : vector<8x128xf32>
    %21 = vector.broadcast %16 : vector<8x1xf32> to vector<8x128xf32>
    %22 = arith.mulf %20, %21 : vector<8x128xf32>
    %23 = vector.broadcast %17 : vector<1x128xf32> to vector<8x128xf32>
    %24 = arith.mulf %22, %23 : vector<8x128xf32>
    %25 = vector.broadcast %18 : vector<1x128xf32> to vector<8x128xf32>
    %26 = arith.addf %24, %25 : vector<8x128xf32>
    %c0_10 = arith.constant 0 : index
    %c0_11 = arith.constant 0 : index
    %27 = vector.load %arg4[%c0_10, %c0_11] : memref<8x128xf32, #tpu.memory_space<vmem>>, vector<8x128xf32>
    tpu.vector_store %arg4[%c0_10, %c0_11], %26 {strides = array<i32>} : memref<8x128xf32, #tpu.memory_space<vmem>>, vector<8x128xf32>,
    return
  }
  func.func @transform_0(%arg0: i32) -> (i32, i32) {
    %c0_i32 = arith.constant 0 : i32
    %c0_i32_0 = arith.constant 0 : i32
    return %arg0, %c0_i32 : i32, i32
  }
  func.func @transform_1(%arg0: i32) -> (i32, i32) {
    %c0_i32 = arith.constant 0 : i32
    %c0_i32_0 = arith.constant 0 : i32
    %c0_i32_1 = arith.constant 0 : i32
    return %c0_i32, %c0_i32_0 : i32, i32
  }
  func.func @transform_2(%arg0: i32) -> (i32, i32) {
    %c0_i32 = arith.constant 0 : i32
    %c0_i32_0 = arith.constant 0 : i32
    %c0_i32_1 = arith.constant 0 : i32
    return %c0_i32, %c0_i32_0 : i32, i32
  }
  func.func @transform_3(%arg0: i32) -> (i32, i32) {
    %c0_i32 = arith.constant 0 : i32
    %c0_i32_0 = arith.constant 0 : i32
    return %arg0, %c0_i32 : i32, i32
  }
}

</mosaic_0001>

<bundles_post_ra>
// kernel: tpu_custom_call.1
= control target key start
LH: loop header
LB: loop body
LE: loop exit
PB: predicated region body
PF: predicated region fallthrough
CT: control target
= control target key end

     0   :  { %8 = vsyncpa [#allocation3], 0  ;;  %s652_s0 = inlined_call_operand.hbm [shape: f32[16,128], index: 0, kind: input, shape index: {}]   ;;  %s653_s1 = inlined_call_operand.vmem [shape: f32[1,128], index: 1, kind: input, shape index: {}]   ;;  %s654_s2 = inlined_call_operand.vmem [shape: f32[1,128], index: 2, kind: input, shape index: {}]   ;;  %s655_s3 = inlined_call_operand.hbm [shape: f32[16,128], index: 3, kind: output, shape index: {}]  }
   0x1   :  { %10 = vsyncpa [#allocation3 + $0x1], 0 }
   0x2   :  { %11 = vsyncpa [#allocation4], 0 }
   0x3   :  { %13 = vsyncpa [#allocation4 + $0x1], 0  ;;  %s485_s12 = smov 0   ;;  %s487_s13 = smov 0  }
   0x4   :  { %s489_s14 = smov 0   ;;  %s491_s15 = smov 0  }
   0x5 LB: > { %s506_s16 = sadd.s32 4294967295, %s461_s15   ;;  %s303_s17 = sadd.s32 4294967294, %s461_s15   ;;  %s461_s15 = sphi %s491_s15, %s670_s15   ;;  %s457_s14 = sphi %s489_s14, %s669_s14   ;;  %s453_s13 = sphi %s487_s13, %s668_s13   ;;  %s449_s12 = sphi %s485_s12, %s667_s12  }
   0x6   : > { %s510_s18 = sadd.s32 1, %s461_s15   ;;  %s26_s19 = sadd.s32 1, %s457_s14 }
   0x7   : > { %s23_s20 = ssub.s32 %s461_s15, %s510_s18  ;;  %p33_p0 = scmp.ne.s32.totalorder %s457_s14, %s453_s13 }
   0x8   : > { %p24_p1 = scmp.eq.s32.totalorder %s23_s20, 0  ;;  %p34_p2 = scmp.eq.s32.totalorder %s461_s15, 0 }
   0x9   : > { %p39_p3 = scmp.ne.s32.totalorder %s453_s13, %s449_s12  ;;  %p40_p4 = scmp.eq.s32.totalorder %s506_s16, 0 }
   0xa   : > { %s522_s21 = scalar_select %p24_p1, %s457_s14, %s26_s19  }
   0xb   : > { %p524_p5 = por %p34_p2, %p33_p0  ;;  %p528_p6 = por %p40_p4, %p39_p3 }
   0xc   : > { %p105_p7 = scmp.eq.s32.totalorder %s506_s16, 1  ;;  %p111_p8 = scmp.eq.s32.totalorder %s303_s17, 1 }
   0xd   : > { %p329_p10 = scmp.lt.s32.totalorder %s461_s15, 2  ;;  %s137_s26 = sand.u32 1, %s457_s14  }
   0xe   : > { %p535_p11 = por %p105_p7, %p33_p0  ;;  %p539_p12 = por %p111_p8, %p39_p3 }
   0xf   : > { %s307_s27 = sshll.u32 %s461_s15, 7  ;;  %s306_s28 = sshll.u32 %s137_s26, 3 }
  0x10   : > { %s659_s24 = scalar_select %p535_p11, 1, 0 }
  0x11   : > { %s660_s25 = scalar_select %p539_p12, 1, 0 }
  0x12   : > { %s548_s4 = scalar_lea.hbm %s652_s0, %s307_s27  ;;  %s141_s5 = scalar_lea.vmem [#allocation2], %s306_s28 }
  0x13   : > { %s148_s6 = sshll.u32 %s141_s5, 4  ;;  %p552_p13 = pnand %p329_p10, %p524_p5  ;;  %s556_s6 = int_to_ptr.vmem [resolvable:$true] %s148_s6 }
  0x14   : > { %s138_s8 = scalar_lea.sflag [#allocation3], %s137_s26  ;;  %s365_s9 = scalar_lea.hbm %s548_s4, 128 }
  0x15   : > { %p366_p2 = scmp.ne.s32.totalorder %s548_s4, %s365_s9  ;;  %p367_p3 = pneg %p552_p13 }
  0x16   : > { %s370_s17 = scalar_lea.hbm %s652_s0, 256  ;;  %p371_p5 = scmp.lt.u32.totalorder %s548_s4, %s652_s0 }
  0x17   : > { %p368_p4 = pnand %p367_p3, %p366_p2  ;;  %p372_p8 = scmp.lt.u32.totalorder %s370_s17, %s365_s9 }
  0x18   : > { %p374_p9 = scmp.lt.u32.totalorder %s365_s9, %s548_s4 }
  0x19   : > { %p369_p7 = pneg %p368_p4  ;;  %p373_p10 = por %p372_p8, %p371_p5 }
  0x1b   : > { %p375_p0 = por %p374_p9, %p373_p10 }
  0x1d   : > { %p376_p1 = pnand %p375_p0, %p369_p7 }
  0x1f   : > { %379 = shalt.err (!%p376_p1)
}
  0x20   : > { %s380_s22 = scalar_lea.vmem %s556_s6, 128  ;;  %s463_s26 = smov [#allocation2]  }
  0x21   : > { %p381_p2 = scmp.ne.s32.totalorder %s556_s6, %s380_s22  ;;  %s385_s27 = sshll.u32 %s463_s26, 4  ;;  %s386_s27 = int_to_ptr.vmem [resolvable:$false] %s385_s27 }
  0x22   : > { %s387_s28 = scalar_lea.vmem %s386_s27, 256  ;;  %p388_p11 = scmp.lt.s32.totalorder %s556_s6, %s386_s27 }
  0x23   : > { %p383_p4 = pnand %p381_p2, %p367_p3  ;;  %p389_p5 = scmp.lt.s32.totalorder %s387_s28, %s380_s22 }
  0x25   : > { %p384_p12 = pneg %p383_p4  ;;  %p390_p8 = por %p389_p5, %p388_p11 }
  0x27   : > { %p391_p9 = pnand %p390_p8, %p384_p12 }
  0x29   : > { %394 = shalt.err (!%p391_p9)
}
  0x2a   : > { %324 = dma.hbm_to_vmem [thread:$0]  (!%p552_p13), %s548_s4, 128, %s556_s6, %s138_s8  }
  0x2b   : > { %p662_p0 = scmp.lt.s32.totalorder %s461_s15, 3  ;;  %p663_p1 = scmp.ge.s32.totalorder %s461_s15, 1 }
  0x2d   : > { %p154_p3 = pnand %p663_p1, %p662_p0 }
  0x2e   : > { %s590_s29 = sand.u32 (!%p154_p3), 1, %s453_s13  }
  0x2f   : > { %157 = sbr.rel (%p154_p3) target bundleno = 241 (0xf1), region = 32  ;;  %s309_s30 = sshll.u32 (!%p154_p3), %s590_s29, 3 }
  0x30   : > { %s160_s5 = scalar_lea.sflag (!%p154_p3), [#allocation3], %s590_s29  ;;  %s163_s9 = scalar_lea.vmem (!%p154_p3), [#allocation2], %s309_s30 }
  0x36   : > { %440 = dma.done.wait (%p528_p6), %s160_s5, 128  }
  0x37   : > { %442 = vsyncadd (%p528_p6), %s160_s5, 4294967168  ;;  %v186_v0 = vld [vmem:[%s163_s9] sm:$0xff]  ;;  %s314_s8 = sshll.u32 %s506_s16, 7  ;;  %s185_s10 = scalar_lea.vmem [#allocation5], %s309_s30 }
  0x38   : > { %187 = vadd.xlane.f32.xlu0 %v186_v0  ;;  %v191_v1 = vmul.f32 %v186_v0, %v186_v0  ;;  %v311_v12 = vld [vmem:[%s653_s1] ss:$0 sm:$0xff]  ;;  %s233_s11 = sshll.u32 %s185_s10, 4  ;;  %s608_s20 = scalar_lea.hbm %s655_s3, %s314_s8  ;;  %s610_s11 = int_to_ptr.vmem [resolvable:$true] %s233_s11 }
  0x39   : > { %v312_v14 = vld [vmem:[%s654_s2] ss:$0 sm:$0xff]  ;;  %s220_s22 = scalar_lea.sflag [#allocation4], %s590_s29  ;;  %s395_s26 = scalar_lea.vmem %s610_s11, 128 }
  0x3a   : > { %p396_p6 = scmp.ne.s32.totalorder %s610_s11, %s395_s26  ;;  %p664_p11 = scmp.ne.s32.totalorder %s659_s24, 0 }
  0x3b   : > { %s464_s16 = smov [#allocation5]  }
  0x3c   : > { %192 = vadd.xlane.f32.xlu0 %v191_v1  ;;  %p397_p12 = pnand %p396_p6, %p664_p11  ;;  %s399_s27 = sshll.u32 %s464_s16, 4  ;;  %s400_s27 = int_to_ptr.vmem [resolvable:$false] %s399_s27 }
  0x3d   : > { %s401_s28 = scalar_lea.vmem %s400_s27, 256  ;;  %p402_p7 = scmp.lt.s32.totalorder %s610_s11, %s400_s27 }
  0x3e   : > { %p398_p13 = pneg %p397_p12  ;;  %p403_p10 = scmp.lt.s32.totalorder %s401_s28, %s395_s26 }
  0x40   : > { %p404_p2 = por %p403_p10, %p402_p7 }
  0x42   : > { %p405_p4 = pnand %p404_p2, %p398_p13 }
  0xc5   : > { %v188_v2 = vpop.xlane.xlu0 %187 }
  0xc6   : > { %v190_v3 = vmul.f32 0.0078125, %v188_v2 }
  0xc8   : > { %v195_v5 = vmul.f32 %v190_v3, %v190_v3  ;;  %v202_v10 = vsub.f32 %v186_v0, %v190_v3 }
  0xc9   : > { %v193_v4 = vpop.xlane.xlu0 %192 }
  0xca   : > { %v194_v6 = vmul.f32 0.0078125, %v193_v4 }
  0xcc   : > { %v196_v7 = vsub.f32 %v194_v6, %v195_v5 }
  0xce   : > { %v197_v8 = vmax.f32 %v196_v7, 0.0 }
  0xd0   : > { %v198_v9 = vadd.f32 1e-05, %v197_v8 }
  0xd2   : > { %363 = vrsqrt.f32 %v198_v9 }
  0xdc   : > { %v364_v11 = vpop.eup %363 }
  0xdd   : > { %v203_v13 = vmul.f32 %v364_v11, %v202_v10 }
  0xdf   : > { %v210_v15 = vmul.f32 %v311_v12, %v203_v13 }
  0xe1   : > { %v217_v16 = vadd.f32 %v312_v14, %v210_v15 }
  0xe3   : > { %218 = vst [vmem:[%s185_s10] sm:$0xff] %v217_v16 }
  0xe4   : > { %408 = shalt.err (!%p405_p4)
}
  0xe5   : > { %s409_s29 = scalar_lea.hbm %s608_s20, 128  ;;  %s413_s9 = scalar_lea.hbm %s655_s3, 256 }
  0xe6   : > { %p410_p5 = scmp.ne.s32.totalorder %s608_s20, %s409_s29  ;;  %p414_p0 = scmp.lt.u32.totalorder %s608_s20, %s655_s3 }
  0xe7   : > { %p415_p1 = scmp.lt.u32.totalorder %s413_s9, %s409_s29  ;;  %p417_p6 = scmp.lt.u32.totalorder %s409_s29, %s608_s20 }
  0xe8   : > { %p411_p8 = pnand %p410_p5, %p664_p11 }
  0xe9   : > { %p416_p3 = por %p415_p1, %p414_p0 }
  0xea   : > { %p412_p9 = pneg %p411_p8 }
  0xeb   : > { %p418_p12 = por %p417_p6, %p416_p3 }
  0xed   : > { %p419_p13 = pnand %p418_p12, %p412_p9 }
  0xef   : > { %422 = shalt.err (!%p419_p13)
}
  0xf0   : > { %319 = dma.vmem_to_hbm [thread:$0]  (%p664_p11), %s610_s11, 128, %s608_s20, %s220_s22  }
  0xf1 PF: > { %s245_s6 = sand.u32 1, %s449_s12   ;;  %p665_p7 = scmp.ne.s32.totalorder %s660_s25, 0 }
  0xf2   : > { %p666_p10 = scmp.ge.s32.totalorder %s461_s15, 2  ;;  %s246_s7 = scalar_lea.sflag [#allocation4], %s245_s6 }
  0xf4   : > { %p326_p2 = pnand %p666_p10, %p665_p7 }
  0xf6   : > { %444 = dma.done.wait (!%p326_p2), %s246_s7, 128  }
  0xf7   : > { %446 = vsyncadd (!%p326_p2), %s246_s7, 4294967168  ;;  %p16_p4 = scmp.ge.s32.totalorder %s510_s18, 4   ;;  %s667_s12 = smov %s453_s13 }
  0xf8   : > { %s668_s13 = smov %s457_s14  ;;  %s669_s14 = smov %s522_s21 }
  0xf9   : > { %s670_s15 = smov %s510_s18  ;;  %18 = sbr.rel (!%p16_p4) target bundleno = 5 (0x5), region = 77 }
 0x100   :  { %251 = vsyncpa [#allocation3], 1 }
 0x101   :  { %253 = vsyncpa [#allocation3 + $0x1], 1 }
 0x102   :  { %254 = vsyncpa [#allocation4], 1 }
 0x103   :  { %256 = vsyncpa [#allocation4 + $0x1], 1 }

</bundles_post_ra>
